<compile_context>
chip_gen: v5e
topology: v5e:2x2
jax: 0.10.0
libtpu: 0.0.40
codegen_flags: <defaults>
</compile_context>

<pallas_src>
import functools

import jax
import jax.numpy as jnp
from jax import lax
from jax.experimental import pallas as pl
from jax.experimental.pallas import tpu as pltpu


# ----------------------------------------------------------------------------
# VGG19 features[:35] architecture (torchvision cfg 'E', no batch-norm):
# 16 convs (ReLU after the first 15, none after conv5_4) and 4 max-pools.
# ----------------------------------------------------------------------------
def vgg19_features35_cfg():
    chans = [(3, 64), (64, 64), "M",
             (64, 128), (128, 128), "M",
             (128, 256), (256, 256), (256, 256), (256, 256), "M",
             (256, 512), (512, 512), (512, 512), (512, 512), "M",
             (512, 512), (512, 512), (512, 512), (512, 512)]
    n_conv = sum(1 for c in chans if c != "M")  # 16
    cfg, ci = [], 0
    for c in chans:
        if c == "M":
            cfg.append(("pool",))
        else:
            ci += 1
            cfg.append(("conv", c[0], c[1], ci < n_conv))  # features[34]: no ReLU
    return cfg


VGG_CFG = vgg19_features35_cfg()

_VMEM_LIMIT = 48 * 1024 * 1024   # under v7x's 64 MiB physical VMEM, with headroom


# ----------------------------------------------------------------------------
# Pallas kernels
# ----------------------------------------------------------------------------
def _conv3x3_kernel(x_ref, halo_ref, w_ref, b_ref, o_ref, *, th, wo, relu,
                    pool, fold):
    # x_ref:    (th, wo+2, cin)    bf16 column-padded rows of this tile
    # halo_ref: (2, wo+2, cin)     bf16 row above / below the tile (zero at borders)
    # w_ref:    (9*cin, cout_t)    bf16, K order = (ky, kx, cin)
    # b_ref:    (1, cout_t)        f32
    # o_ref:    (th, wo, cout_t)   or (th//2, wo//2, cout_t) when pool, bf16
    cin = x_ref.shape[-1]
    m = th * wo

    # Assemble the (th+2, wo+2, cin) halo'd block with a cheap leading-dim concat.
    xp = jnp.concatenate([halo_ref[0:1], x_ref[...], halo_ref[1:2]], axis=0)

    windows = [xp[ky:ky + th, kx:kx + wo, :].reshape(m, cin)
               for ky in range(3) for kx in range(3)]
    if fold:
        # Small Cin (<=128): fold the 9 taps into one long-K MXU matmul.
        patch = jnp.concatenate(windows, axis=-1)                # (m, 9*cin)
        acc = jnp.dot(patch, w_ref[...], preferred_element_type=jnp.float32)
    else:
        # Large Cin (256/512): nine K=cin dots accumulated in f32 registers;
        # avoids rebuilding the wide (m, 9*cin) patch (vector-store bound).
        acc = jnp.dot(windows[0], w_ref[0:cin, :],
                      preferred_element_type=jnp.float32)
        for a in range(1, 9):
            acc = acc + jnp.dot(windows[a], w_ref[a * cin:(a + 1) * cin, :],
                                preferred_element_type=jnp.float32)

    r = acc + b_ref[...]                       # f32 epilogue (v5e has no bf16 VPU)
    if relu:
        r = jnp.maximum(r, 0.0)
    cout_t = o_ref.shape[-1]
    r = r.reshape(th, wo, cout_t)
    if pool:                                    # fused 2x2/2 max pool
        r = r.reshape(th // 2, 2, wo // 2, 2, cout_t)
        r = jnp.max(jnp.max(r, axis=3), axis=1)
    o_ref[...] = r.astype(o_ref.dtype)


def _matmul_bias_relu_kernel(x_ref, w_ref, b_ref, o_ref):
    # conv1_1 path: (tm, K) x (K, cout) + bias + ReLU.
    r = jnp.dot(x_ref[...], w_ref[...], preferred_element_type=jnp.float32)
    r = jnp.maximum(r + b_ref[...], 0.0)
    o_ref[...] = r.astype(o_ref.dtype)


def _l1_sum_kernel(a_ref, b_ref, o_ref):
    @pl.when(pl.program_id(0) == 0)
    def _init():
        o_ref[...] = jnp.zeros_like(o_ref)

    d = jnp.abs(a_ref[...].astype(jnp.float32) - b_ref[...].astype(jnp.float32))
    o_ref[...] += jnp.sum(d, keepdims=True)


# ----------------------------------------------------------------------------
# Layer wrappers
# ----------------------------------------------------------------------------
def _pick_row_tile(h, w, pool, target_m):
    """Largest row count that divides h (and is even when pooling is fused)
    with th*w close to target_m."""
    divs = [d for d in range(1, h + 1)
            if h % d == 0 and (not pool or d % 2 == 0)]
    fit = [d for d in divs if d * w <= target_m]
    return max(fit) if fit else min(divs)


def _pick_div(total, cap):
    divs = [d for d in range(1, total + 1) if total % d == 0 and d <= cap]
    pref = [d for d in divs if d % 8 == 0 or d == total]
    return max(pref if pref else divs)


def conv3x3_pallas(x, w, b, relu, pool):
    """3x3 'SAME' conv (+ReLU, + optional fused 2x2/2 max pool).
    x: (N,H,W,Cin) bf16 (Cin >= 64).  w: (3,3,Cin,Cout) bf16.  b: (Cout,) f32."""
    n, h, wd, cin = x.shape
    cout = w.shape[-1]
    if pool:
        assert h % 2 == 0 and wd % 2 == 0, "floor pooling for odd sizes not implemented"

    target_m = 2048 if cin <= 128 else 1024   # keep 256/512-ch tiles v7x-VMEM friendly
    th = _pick_row_tile(h, wd, pool, target_m)
    nt = h // th
    cout_t = min(cout, 256)                   # >=2 cout blocks for 512-ch layers (v7x 2 TC)
    fold = cin <= 128                         # long-K tap fold for small Cin; 9 dots otherwise

    # Column-pad once ('SAME' along W).  Row halos go through the tiny sideband
    # below, so the duplicated halo'd row-tile tensor of the old version is gone.
    # TODO(synk): in-kernel DMA from pl.ANY would drop this remaining pad pass too.
    xp = jnp.pad(x, ((0, 0), (0, 0), (1, 1), (0, 0)))             # (n, h, wd+2, cin)

    # Halo sideband: rows (t*th - 1) and (t*th + th) per tile, zeros at borders.
    ridx = jnp.stack([jnp.arange(nt) * th - 1,
                      jnp.arange(nt) * th + th], axis=1)          # (nt, 2)
    valid = (ridx >= 0) & (ridx < h)
    halos = jnp.where(valid[None, :, :, None, None],
                      xp[:, jnp.clip(ridx, 0, h - 1)],
                      jnp.zeros((), xp.dtype))                    # (n, nt, 2, wd+2, cin)

    wk = w.reshape(9 * cin, cout)                                 # K order (ky, kx, cin)
    b2 = b.reshape(1, cout).astype(jnp.float32)

    ho, wo_out = (h // 2, wd // 2) if pool else (h, wd)
    tho = th // 2 if pool else th
    wp = wd + 2

    return pl.pallas_call(
        functools.partial(_conv3x3_kernel, th=th, wo=wd, relu=relu, pool=pool,
                          fold=fold),
        out_shape=jax.ShapeDtypeStruct((n, ho, wo_out, cout), jnp.bfloat16),
        # Row-tile axis innermost so the (9*Cin, Cout_t) weight block stays
        # VMEM-resident across all row tiles of a (batch, cout-tile) pair.
        grid=(n, cout // cout_t, nt),
        in_specs=[
            pl.BlockSpec((None, th, wp, cin), lambda i, j, t: (i, t, 0, 0)),
            pl.BlockSpec((None, None, 2, wp, cin),
                         lambda i, j, t: (i, t, 0, 0, 0)),
            pl.BlockSpec((9 * cin, cout_t), lambda i, j, t: (0, j)),
            pl.BlockSpec((1, cout_t), lambda i, j, t: (0, j)),
        ],
        out_specs=pl.BlockSpec((None, tho, wo_out, cout_t),
                               lambda i, j, t: (i, t, 0, j)),
        compiler_params=pltpu.CompilerParams(
            dimension_semantics=("parallel", "parallel", "arbitrary"),
            vmem_limit_bytes=_VMEM_LIMIT),
    )(xp, halos, wk, b2)


def conv3x3_c3_pallas(x, w, b):
    """First VGG conv (Cin=3): wrapper-side im2col (K padded 27->32) and one
    dense MXU matmul + bias + ReLU.  The 3-channel input is tiny, so the
    wrapper im2col pass is negligible."""
    n, h, wd, cin = x.shape
    cout = w.shape[-1]
    k, kp = 9 * cin, 32
    xpad = jnp.pad(x, ((0, 0), (1, 1), (1, 1), (0, 0)))
    patch = jnp.concatenate(
        [xpad[:, ky:ky + h, kx:kx + wd, :] for ky in range(3) for kx in range(3)],
        axis=-1)                                                  # (n, h, wd, 27)
    patch = jnp.pad(patch, ((0, 0), (0, 0), (0, 0), (0, kp - k)))
    patch = patch.reshape(n, h * wd, kp)
    wk = jnp.pad(w.reshape(k, cout), ((0, kp - k), (0, 0)))
    b2 = b.reshape(1, cout).astype(jnp.float32)

    tm = _pick_div(h * wd, 2048)
    out = pl.pallas_call(
        _matmul_bias_relu_kernel,
        out_shape=jax.ShapeDtypeStruct((n, h * wd, cout), jnp.bfloat16),
        grid=(n, (h * wd) // tm),
        in_specs=[pl.BlockSpec((None, tm, kp), lambda i, t: (i, t, 0)),
                  pl.BlockSpec((kp, cout), lambda i, t: (0, 0)),
                  pl.BlockSpec((1, cout), lambda i, t: (0, 0))],
        out_specs=pl.BlockSpec((None, tm, cout), lambda i, t: (i, t, 0)),
        compiler_params=pltpu.CompilerParams(
            dimension_semantics=("parallel", "parallel"),
            vmem_limit_bytes=_VMEM_LIMIT),
    )(patch, wk, b2)
    return out.reshape(n, h, wd, cout)


def l1_loss_pallas(fa, fb):
    """Mean absolute difference of two (N,H,W,C) feature maps -> f32 scalar."""
    n = fa.shape[0]
    f = fa.size // n
    a = fa.reshape(n, 1, f)
    b = fb.reshape(n, 1, f)
    tot = pl.pallas_call(
        _l1_sum_kernel,
        out_shape=jax.ShapeDtypeStruct((1, 1), jnp.float32),
        grid=(n,),
        in_specs=[pl.BlockSpec((None, 1, f), lambda i: (i, 0, 0)),
                  pl.BlockSpec((None, 1, f), lambda i: (i, 0, 0))],
        out_specs=pl.BlockSpec((1, 1), lambda i: (0, 0)),
        compiler_params=pltpu.CompilerParams(
            dimension_semantics=("arbitrary",)),
    )(a, b)
    return tot[0, 0] / (n * f)


# ----------------------------------------------------------------------------
# Full model: FeatureExtractor + ContentLoss
# ----------------------------------------------------------------------------
def init_params(key):
    params = []
    for layer in VGG_CFG:
        if layer[0] == "conv":
            _, cin, cout, _ = layer
            key, wk, bk = jax.random.split(key, 3)
            std = (2.0 / (9.0 * cin)) ** 0.5
            w = (jax.random.normal(wk, (3, 3, cin, cout), jnp.float32)
                 * std).astype(jnp.bfloat16)
            b = jax.random.normal(bk, (cout,), jnp.float32) * 0.01
            params.append((w, b))
    return params


def _features_nhwc(x_nchw, params):
    x = jnp.transpose(x_nchw, (0, 2, 3, 1)).astype(jnp.bfloat16)  # NCHW -> NHWC
    pi, i = 0, 0
    while i < len(VGG_CFG):
        layer = VGG_CFG[i]
        assert layer[0] == "conv"        # every pool in VGG_CFG follows a conv
        _, cin, _, relu = layer
        fuse_pool = i + 1 < len(VGG_CFG) and VGG_CFG[i + 1][0] == "pool"
        w, b = params[pi]
        pi += 1
        if cin == 3:
            x = conv3x3_c3_pallas(x, w, b)          # conv1_1: ReLU, no pool after
        else:
            x = conv3x3_pallas(x, w, b, relu=relu, pool=fuse_pool)
        i += 2 if fuse_pool else 1
    return x


def feature_extractor_pallas(x_nchw, params):
    return jnp.transpose(_features_nhwc(x_nchw, params).astype(jnp.float32),
                         (0, 3, 1, 2))


def content_loss_pallas(sr, hr, params):
    return l1_loss_pallas(_features_nhwc(sr, params),
                          _features_nhwc(hr, params))


# ----------------------------------------------------------------------------
# Pure-JAX reference (XLA conv / reduce_window) with matched bf16 precision
# ----------------------------------------------------------------------------
def feature_extractor_ref(x_nchw, params):
    x = jnp.transpose(x_nchw, (0, 2, 3, 1)).astype(jnp.bfloat16)
    pi = 0
    for layer in VGG_CFG:
        if layer[0] == "pool":
            x = lax.reduce_window(x, jnp.array(-jnp.inf, x.dtype), lax.max,
                                  (1, 2, 2, 1), (1, 2, 2, 1), "VALID")
        else:
            w, b = params[pi]
            pi += 1
            y = lax.conv_general_dilated(
                x, w, (1, 1), "SAME",
                dimension_numbers=("NHWC", "HWIO", "NHWC"),
                preferred_element_type=jnp.float32) + b
            if layer[3]:
                y = jnp.maximum(y, 0.0)
            x = y.astype(jnp.bfloat16)
    return jnp.transpose(x.astype(jnp.float32), (0, 3, 1, 2))


def content_loss_ref(sr, hr, params):
    return jnp.mean(jnp.abs(feature_extractor_ref(sr, params)
                            - feature_extractor_ref(hr, params)))


if __name__ == "__main__":
    key = jax.random.PRNGKey(0)
    pkey, skey, hkey = jax.random.split(key, 3)
    params = init_params(pkey)

    # Small NCHW inputs consistent with the module (VGG needs 3 channels).
    sr = jax.random.normal(skey, (2, 3, 16, 16), jnp.float32)
    hr = jax.random.normal(hkey, (2, 3, 16, 16), jnp.float32)

    feats = jax.block_until_ready(feature_extractor_pallas(sr, params))
    assert feats.shape == (2, 512, 1, 1), feats.shape  # 16x16 -> 4 pools -> 1x1

    loss = jax.block_until_ready(content_loss_pallas(sr, hr, params))

    # Validate against the XLA reference (same bf16/f32 precision recipe).
    feats_ref = jax.block_until_ready(feature_extractor_ref(sr, params))
    scale = float(jnp.max(jnp.abs(feats_ref))) + 1e-6
    err = float(jnp.max(jnp.abs(feats - feats_ref)))
    assert err <= 0.05 * scale + 0.05, (err, scale)

    loss_ref = float(content_loss_ref(sr, hr, params))
    assert abs(float(loss) - loss_ref) <= 0.05 * abs(loss_ref) + 1e-3, (
        float(loss), loss_ref)

    print("KERNEL_OK")
</pallas_src>

<mosaic_0001>
module attributes {stable_mosaic.version = 11 : i64} {
  func.func @_matmul_bias_relu_kernel(%arg0: i32, %arg1: i32, %arg2: memref<1x256x32xbf16, #tpu.memory_space<vmem>>, %arg3: memref<32x64xbf16, #tpu.memory_space<vmem>>, %arg4: memref<1x64xf32, #tpu.memory_space<vmem>>, %arg5: memref<1x256x64xbf16, #tpu.memory_space<vmem>>) attributes {dimension_semantics = [#tpu.dimension_semantics<parallel>, #tpu.dimension_semantics<parallel>], iteration_bounds = array<i64: 2, 1>, scalar_prefetch = 0 : i64, scratch_operands = 0 : i64, tpu.core_type = #tpu.core_type<tc>, window_params = [{transform_indices = @transform_0, window_bounds = array<i64: 1, 256, 32>}, {pipeline_mode = #tpu.pipeline_mode<synchronous>, transform_indices = @transform_1, window_bounds = array<i64: 32, 64>}, {pipeline_mode = #tpu.pipeline_mode<synchronous>, transform_indices = @transform_2, window_bounds = array<i64: 1, 64>}, {transform_indices = @transform_3, window_bounds = array<i64: 1, 256, 64>}]} {
    %c0 = arith.constant 0 : index
    %c0_0 = arith.constant 0 : index
    %c0_1 = arith.constant 0 : index
    %0 = vector.load %arg2[%c0, %c0_0, %c0_1] : memref<1x256x32xbf16, #tpu.memory_space<vmem>>, vector<1x256x32xbf16>
    %1 = vector.shape_cast %0 : vector<1x256x32xbf16> to vector<256x32xbf16>
    %c0_2 = arith.constant 0 : index
    %c0_3 = arith.constant 0 : index
    %2 = vector.load %arg3[%c0_2, %c0_3] : memref<32x64xbf16, #tpu.memory_space<vmem>>, vector<32x64xbf16>
    %cst = arith.constant dense<0.000000e+00> : vector<256x64xf32>
    %3 = tpu.matmul %1, %2, %cst {dimension_numbers = #tpu.dot_dimension_numbers<[1], [0], [0], [1], [0, 0, 1, 1], [], []>} : vector<256x32xbf16>, vector<32x64xbf16>, vector<256x64xf32> -> vector<256x64xf32>
    %c0_4 = arith.constant 0 : index
    %c0_5 = arith.constant 0 : index
    %4 = vector.load %arg4[%c0_4, %c0_5] : memref<1x64xf32, #tpu.memory_space<vmem>>, vector<1x64xf32>
    %5 = vector.broadcast %4 : vector<1x64xf32> to vector<256x64xf32>
    %6 = arith.addf %3, %5 : vector<256x64xf32>
    %cst_6 = arith.constant 0.000000e+00 : f32
    %7 = vector.broadcast %cst_6 : f32 to vector<256x64xf32>
    %8 = arith.maximumf %6, %7 : vector<256x64xf32>
    %9 = arith.truncf %8 : vector<256x64xf32> to vector<256x64xbf16>
    %c0_7 = arith.constant 0 : index
    %c0_8 = arith.constant 0 : index
    %c0_9 = arith.constant 0 : index
    %10 = vector.load %arg5[%c0_7, %c0_8, %c0_9] : memref<1x256x64xbf16, #tpu.memory_space<vmem>>, vector<1x256x64xbf16>
    %11 = vector.shape_cast %10 : vector<1x256x64xbf16> to vector<256x64xbf16>
    %12 = vector.shape_cast %9 : vector<256x64xbf16> to vector<1x256x64xbf16>
    tpu.vector_store %arg5[%c0_7, %c0_8, %c0_9], %12 {strides = array<i32>} : memref<1x256x64xbf16, #tpu.memory_space<vmem>>, vector<1x256x64xbf16>,
    return
  }
  func.func @transform_0(%arg0: i32, %arg1: i32) -> (i32, i32, i32) {
    %c0_i32 = arith.constant 0 : i32
    %c0_i32_0 = arith.constant 0 : i32
    return %arg0, %arg1, %c0_i32 : i32, i32, i32
  }
  func.func @transform_1(%arg0: i32, %arg1: i32) -> (i32, i32) {
    %c0_i32 = arith.constant 0 : i32
    %c0_i32_0 = arith.constant 0 : i32
    %c0_i32_1 = arith.constant 0 : i32
    return %c0_i32, %c0_i32_0 : i32, i32
  }
  func.func @transform_2(%arg0: i32, %arg1: i32) -> (i32, i32) {
    %c0_i32 = arith.constant 0 : i32
    %c0_i32_0 = arith.constant 0 : i32
    %c0_i32_1 = arith.constant 0 : i32
    return %c0_i32, %c0_i32_0 : i32, i32
  }
  func.func @transform_3(%arg0: i32, %arg1: i32) -> (i32, i32, i32) {
    %c0_i32 = arith.constant 0 : i32
    %c0_i32_0 = arith.constant 0 : i32
    return %arg0, %arg1, %c0_i32 : i32, i32, i32
  }
}

</mosaic_0001>

<bundles_post_ra>
// kernel: tpu_custom_call.1
= control target key start
LH: loop header
LB: loop body
LE: loop exit
PB: predicated region body
PF: predicated region fallthrough
CT: control target
= control target key end

     0   :  { %s859_s12 = smov 0   ;;  %s861_s13 = smov 0   ;;  %s1042_s0 = inlined_call_operand.vmem [shape: bf16[2,256,32], index: 0, kind: input, shape index: {}]   ;;  %s1043_s1 = inlined_call_operand.vmem [shape: bf16[32,64], index: 1, kind: input, shape index: {}]   ;;  %s1044_s2 = inlined_call_operand.vmem [shape: f32[1,64], index: 2, kind: input, shape index: {}]   ;;  %s1045_s3 = inlined_call_operand.vmem [shape: bf16[2,256,64], index: 3, kind: output, shape index: {}]  }
   0x1   :  { %s863_s14 = smov 0  }
   0x2 LB: > { %s25_s15 = sadd.s32 1, %s833_s13  ;;  %p669_p0 = scmp.ge.s32.totalorder %s837_s14, 1  ;;  %s837_s14 = sphi %s863_s14, %s13_s14   ;;  %s833_s13 = sphi %s861_s13, %s1047_s13   ;;  %s829_s12 = sphi %s859_s12, %s1046_s12  }
   0x3   : > { %p27_p1 = scmp.ge.s32.totalorder %s25_s15, 2  ;;  %p158_p2 = scmp.lt.s32.totalorder %s837_s14, 3 }
   0x5   : > { %s1049_s15 = smov (%p27_p1, %s25_s15), 0  ;;  %p159_p3 = pnand %p669_p0, %p158_p2 }
   0x6   : > { %p191_p4 = scmp.lt.s32.totalorder (!%p159_p3), %s829_s12, 1 }
   0x7   : > { %162 = sbr.rel (%p159_p3) target bundleno = 217 (0xd9), region = 32 }
   0xc   : > { %v783_v0 = vld [vmem:[%s1043_s1 + $0x8] sm:$0xff]  ;;  %v782_v1 = vld [vmem:[%s1043_s1] sm:$0xff]  ;;  %s1051_s12 = smov (!%p191_p4, %s829_s12), 1  ;;  %vm343_vm0 = vcmask 261120   ;;  %vm545_vm1 = vcmask 519168  }
   0xd   : > { %398 = vmatpush.bf16.msra.mxu0 %v783_v0  ;;  %784 = vmatpush.bf16.msra.mxu1 %v783_v0  ;;  %s764_s20 = sshll.u32 %s1051_s12, 7  ;;  %v928_v18 = vld [vmem:[%s1044_s2] ss:$0 sm:$0xff] }
   0xe   : > { %785 = vmatpush.bf16.msra.mxu2 %v783_v0  ;;  %786 = vmatpush.bf16.msra.mxu3 %v783_v0  ;;  %s891_s23 = scalar_lea.vmem %s1042_s0, %s764_s20  ;;  %s937_s28 = scalar_lea.vmem %s1045_s3, %s764_s20 }
   0xf   : > { %v766_v2 = vld [vmem:[%s891_s23] sm:$0xff]  ;;  %v767_v6 = vld [vmem:[%s891_s23 + $0x8] sm:$0xff]  ;;  %v768_v10 = vld [vmem:[%s891_s23 + $0x10] sm:$0xff] }
  0x10   : > { %v770_v3 = vld [vmem:[%s891_s23 + $0x20] sm:$0xff]  ;;  %v771_v7 = vld [vmem:[%s891_s23 + $0x28] sm:$0xff]  ;;  %v772_v11 = vld [vmem:[%s891_s23 + $0x30] sm:$0xff] }
  0x11   : > { %399 = vmatpush.bf16.msra.mxu0 %v782_v1  ;;  %787 = vmatpush.bf16.msra.mxu1 %v782_v1  ;;  %v774_v4 = vld [vmem:[%s891_s23 + $0x40] sm:$0xff]  ;;  %v775_v8 = vld [vmem:[%s891_s23 + $0x48] sm:$0xff]  ;;  %v776_v12 = vld [vmem:[%s891_s23 + $0x50] sm:$0xff] }
  0x12   : > { %788 = vmatpush.bf16.msra.mxu2 %v782_v1  ;;  %789 = vmatpush.bf16.msra.mxu3 %v782_v1  ;;  %v778_v5 = vld [vmem:[%s891_s23 + $0x60] sm:$0xff]  ;;  %v779_v9 = vld [vmem:[%s891_s23 + $0x68] sm:$0xff]  ;;  %v780_v13 = vld [vmem:[%s891_s23 + $0x70] sm:$0xff] }
  0x13   : > { %v769_v14 = vld [vmem:[%s891_s23 + $0x18] sm:$0xff] }
  0x14   : > { %746 = vmatmul.msk.bf16.vlgmr.msra.gmra.mxu0 %vm343_vm0, %v766_v2  ;;  %750 = vmatmul.msk.bf16.vlgmr.msra.gmra.mxu1 %vm343_vm0, %v770_v3  ;;  %v773_v15 = vld [vmem:[%s891_s23 + $0x38] sm:$0xff] }
  0x15   : > { %754 = vmatmul.msk.bf16.vlgmr.msra.gmra.mxu2 %vm343_vm0, %v774_v4  ;;  %758 = vmatmul.msk.bf16.vlgmr.msra.gmra.mxu3 %vm343_vm0, %v778_v5  ;;  %v777_v16 = vld [vmem:[%s891_s23 + $0x58] sm:$0xff] }
  0x16   : > { %v781_v17 = vld [vmem:[%s891_s23 + $0x78] sm:$0xff] }
  0x24   : > { %747 = vmatmul.msk.bf16.gmra.mxu0 %vm343_vm0, %v767_v6  ;;  %751 = vmatmul.msk.bf16.gmra.mxu1 %vm343_vm0, %v771_v7 }
  0x25   : > { %755 = vmatmul.msk.bf16.gmra.mxu2 %vm343_vm0, %v775_v8  ;;  %759 = vmatmul.msk.bf16.gmra.mxu3 %vm343_vm0, %v779_v9 }
  0x34   : > { %748 = vmatmul.msk.bf16.gmra.mxu0 %vm343_vm0, %v768_v10  ;;  %752 = vmatmul.msk.bf16.gmra.mxu1 %vm343_vm0, %v772_v11 }
  0x35   : > { %756 = vmatmul.msk.bf16.gmra.mxu2 %vm343_vm0, %v776_v12  ;;  %760 = vmatmul.msk.bf16.gmra.mxu3 %vm343_vm0, %v780_v13 }
  0x44   : > { %749 = vmatmul.msk.bf16.gmra.mxu0 %vm343_vm0, %v769_v14  ;;  %753 = vmatmul.msk.bf16.gmra.mxu1 %vm343_vm0, %v773_v15 }
  0x45   : > { %757 = vmatmul.msk.bf16.gmra.mxu2 %vm343_vm0, %v777_v16  ;;  %761 = vmatmul.msk.bf16.gmra.mxu3 %vm343_vm0, %v781_v17 }
  0x91   : > { %v401_v19 = vpop.f32.mrf.mxu0  ;;  %v421_v20 = vpop.f32.mrf.mxu1 }
  0x92   : > { %v402_v21 = vadd.f32 %v928_v18, %v401_v19  ;;  %v422_v22 = vadd.f32 %v928_v18, %v421_v20 }
  0x94   : > { %v481_v23 = vmax.f32 %v402_v21, 0.0  ;;  %v489_v24 = vmax.f32 %v422_v22, 0.0 }
  0x96   : > { %v513_v25 = vpack.c.bf16 %v481_v23, %v481_v23  ;;  %v521_v26 = vpack.c.bf16 %v489_v24, %v489_v24 }
  0x98   : > { %546 = vst.msk [vmem:[%s937_s28] sm:$0xf] %vm545_vm1, %v513_v25  ;;  %v441_v27 = vpop.f32.mrf.mxu2  ;;  %v461_v28 = vpop.f32.mrf.mxu3 }
  0x99   : > { %554 = vst.msk [vmem:[%s937_s28 + $0x20] sm:$0xf] %vm545_vm1, %v521_v26  ;;  %v442_v29 = vadd.f32 %v928_v18, %v441_v27  ;;  %v462_v30 = vadd.f32 %v928_v18, %v461_v28  ;;  %v403_v31 = vpop.f32.mrf.mxu0  ;;  %v423_v32 = vpop.f32.mrf.mxu1 }
  0x9a   : > { %v404_v33 = vadd.f32 %v928_v18, %v403_v31  ;;  %v424_v34 = vadd.f32 %v928_v18, %v423_v32 }
  0x9b   : > { %v497_v35 = vmax.f32 %v442_v29, 0.0  ;;  %v505_v36 = vmax.f32 %v462_v30, 0.0 }
  0x9c   : > { %v482_v37 = vmax.f32 %v404_v33, 0.0  ;;  %v490_v38 = vmax.f32 %v424_v34, 0.0 }
  0x9d   : > { %v529_v39 = vpack.c.bf16 %v497_v35, %v497_v35  ;;  %v537_v40 = vpack.c.bf16 %v505_v36, %v505_v36 }
  0x9e   : > { %v514_v41 = vpack.c.bf16 %v482_v37, %v482_v37  ;;  %v522_v42 = vpack.c.bf16 %v490_v38, %v490_v38 }
  0x9f   : > { %562 = vst.msk [vmem:[%s937_s28 + $0x40] sm:$0xf] %vm545_vm1, %v529_v39 }
  0xa0   : > { %570 = vst.msk [vmem:[%s937_s28 + $0x60] sm:$0xf] %vm545_vm1, %v537_v40  ;;  %v443_v43 = vpop.f32.mrf.mxu2  ;;  %v463_v44 = vpop.f32.mrf.mxu3 }
  0xa1   : > { %547 = vst.msk [vmem:[%s937_s28 + $0x4] sm:$0xf] %vm545_vm1, %v514_v41  ;;  %v444_v45 = vadd.f32 %v928_v18, %v443_v43  ;;  %v464_v46 = vadd.f32 %v928_v18, %v463_v44  ;;  %v406_v47 = vpop.f32.mrf.mxu0  ;;  %v426_v48 = vpop.f32.mrf.mxu1 }
  0xa2   : > { %555 = vst.msk [vmem:[%s937_s28 + $0x24] sm:$0xf] %vm545_vm1, %v522_v42  ;;  %v407_v49 = vadd.f32 %v928_v18, %v406_v47  ;;  %v427_v50 = vadd.f32 %v928_v18, %v426_v48 }
  0xa3   : > { %v498_v51 = vmax.f32 %v444_v45, 0.0  ;;  %v506_v52 = vmax.f32 %v464_v46, 0.0 }
  0xa4   : > { %v483_v53 = vmax.f32 %v407_v49, 0.0  ;;  %v491_v54 = vmax.f32 %v427_v50, 0.0 }
  0xa5   : > { %v530_v55 = vpack.c.bf16 %v498_v51, %v498_v51  ;;  %v538_v56 = vpack.c.bf16 %v506_v52, %v506_v52 }
  0xa6   : > { %v515_v57 = vpack.c.bf16 %v483_v53, %v483_v53  ;;  %v523_v58 = vpack.c.bf16 %v491_v54, %v491_v54 }
  0xa7   : > { %563 = vst.msk [vmem:[%s937_s28 + $0x44] sm:$0xf] %vm545_vm1, %v530_v55 }
  0xa8   : > { %571 = vst.msk [vmem:[%s937_s28 + $0x64] sm:$0xf] %vm545_vm1, %v538_v56  ;;  %v446_v59 = vpop.f32.mrf.mxu2  ;;  %v466_v60 = vpop.f32.mrf.mxu3 }
  0xa9   : > { %548 = vst.msk [vmem:[%s937_s28 + $0x8] sm:$0xf] %vm545_vm1, %v515_v57  ;;  %v447_v61 = vadd.f32 %v928_v18, %v446_v59  ;;  %v467_v62 = vadd.f32 %v928_v18, %v466_v60  ;;  %v408_v63 = vpop.f32.mrf.mxu0  ;;  %v428_v0 = vpop.f32.mrf.mxu1 }
  0xaa   : > { %556 = vst.msk [vmem:[%s937_s28 + $0x28] sm:$0xf] %vm545_vm1, %v523_v58  ;;  %v409_v1 = vadd.f32 %v928_v18, %v408_v63  ;;  %v429_v2 = vadd.f32 %v928_v18, %v428_v0 }
  0xab   : > { %v499_v3 = vmax.f32 %v447_v61, 0.0  ;;  %v507_v4 = vmax.f32 %v467_v62, 0.0 }
  0xac   : > { %v484_v5 = vmax.f32 %v409_v1, 0.0  ;;  %v492_v6 = vmax.f32 %v429_v2, 0.0 }
  0xad   : > { %v531_v7 = vpack.c.bf16 %v499_v3, %v499_v3  ;;  %v539_v8 = vpack.c.bf16 %v507_v4, %v507_v4 }
  0xae   : > { %v516_v9 = vpack.c.bf16 %v484_v5, %v484_v5  ;;  %v524_v10 = vpack.c.bf16 %v492_v6, %v492_v6 }
  0xaf   : > { %564 = vst.msk [vmem:[%s937_s28 + $0x48] sm:$0xf] %vm545_vm1, %v531_v7 }
  0xb0   : > { %572 = vst.msk [vmem:[%s937_s28 + $0x68] sm:$0xf] %vm545_vm1, %v539_v8  ;;  %v448_v11 = vpop.f32.mrf.mxu2  ;;  %v468_v12 = vpop.f32.mrf.mxu3 }
  0xb1   : > { %549 = vst.msk [vmem:[%s937_s28 + $0xc] sm:$0xf] %vm545_vm1, %v516_v9  ;;  %v449_v13 = vadd.f32 %v928_v18, %v448_v11  ;;  %v469_v14 = vadd.f32 %v928_v18, %v468_v12  ;;  %v411_v15 = vpop.f32.mrf.mxu0  ;;  %v431_v16 = vpop.f32.mrf.mxu1 }
  0xb2   : > { %557 = vst.msk [vmem:[%s937_s28 + $0x2c] sm:$0xf] %vm545_vm1, %v524_v10  ;;  %v412_v17 = vadd.f32 %v928_v18, %v411_v15  ;;  %v432_v19 = vadd.f32 %v928_v18, %v431_v16 }
  0xb3   : > { %v500_v20 = vmax.f32 %v449_v13, 0.0  ;;  %v508_v21 = vmax.f32 %v469_v14, 0.0 }
  0xb4   : > { %v485_v22 = vmax.f32 %v412_v17, 0.0  ;;  %v493_v23 = vmax.f32 %v432_v19, 0.0 }
  0xb5   : > { %v532_v24 = vpack.c.bf16 %v500_v20, %v500_v20  ;;  %v540_v25 = vpack.c.bf16 %v508_v21, %v508_v21 }
  0xb6   : > { %v517_v26 = vpack.c.bf16 %v485_v22, %v485_v22  ;;  %v525_v27 = vpack.c.bf16 %v493_v23, %v493_v23 }
  0xb7   : > { %565 = vst.msk [vmem:[%s937_s28 + $0x4c] sm:$0xf] %vm545_vm1, %v532_v24 }
  0xb8   : > { %573 = vst.msk [vmem:[%s937_s28 + $0x6c] sm:$0xf] %vm545_vm1, %v540_v25  ;;  %v451_v28 = vpop.f32.mrf.mxu2  ;;  %v471_v29 = vpop.f32.mrf.mxu3 }
  0xb9   : > { %550 = vst.msk [vmem:[%s937_s28 + $0x10] sm:$0xf] %vm545_vm1, %v517_v26  ;;  %v452_v30 = vadd.f32 %v928_v18, %v451_v28  ;;  %v472_v31 = vadd.f32 %v928_v18, %v471_v29  ;;  %v413_v32 = vpop.f32.mrf.mxu0  ;;  %v433_v33 = vpop.f32.mrf.mxu1 }
  0xba   : > { %558 = vst.msk [vmem:[%s937_s28 + $0x30] sm:$0xf] %vm545_vm1, %v525_v27  ;;  %v414_v34 = vadd.f32 %v928_v18, %v413_v32  ;;  %v434_v35 = vadd.f32 %v928_v18, %v433_v33 }
  0xbb   : > { %v501_v36 = vmax.f32 %v452_v30, 0.0  ;;  %v509_v37 = vmax.f32 %v472_v31, 0.0 }
  0xbc   : > { %v486_v38 = vmax.f32 %v414_v34, 0.0  ;;  %v494_v39 = vmax.f32 %v434_v35, 0.0 }
  0xbd   : > { %v533_v40 = vpack.c.bf16 %v501_v36, %v501_v36  ;;  %v541_v41 = vpack.c.bf16 %v509_v37, %v509_v37 }
  0xbe   : > { %v518_v42 = vpack.c.bf16 %v486_v38, %v486_v38  ;;  %v526_v43 = vpack.c.bf16 %v494_v39, %v494_v39 }
  0xbf   : > { %566 = vst.msk [vmem:[%s937_s28 + $0x50] sm:$0xf] %vm545_vm1, %v533_v40 }
  0xc0   : > { %574 = vst.msk [vmem:[%s937_s28 + $0x70] sm:$0xf] %vm545_vm1, %v541_v41  ;;  %v453_v44 = vpop.f32.mrf.mxu2  ;;  %v473_v45 = vpop.f32.mrf.mxu3 }
  0xc1   : > { %551 = vst.msk [vmem:[%s937_s28 + $0x14] sm:$0xf] %vm545_vm1, %v518_v42  ;;  %v454_v46 = vadd.f32 %v928_v18, %v453_v44  ;;  %v474_v47 = vadd.f32 %v928_v18, %v473_v45  ;;  %v416_v48 = vpop.f32.mrf.mxu0  ;;  %v436_v49 = vpop.f32.mrf.mxu1 }
  0xc2   : > { %559 = vst.msk [vmem:[%s937_s28 + $0x34] sm:$0xf] %vm545_vm1, %v526_v43  ;;  %v417_v50 = vadd.f32 %v928_v18, %v416_v48  ;;  %v437_v51 = vadd.f32 %v928_v18, %v436_v49 }
  0xc3   : > { %v502_v52 = vmax.f32 %v454_v46, 0.0  ;;  %v510_v53 = vmax.f32 %v474_v47, 0.0 }
  0xc4   : > { %v487_v54 = vmax.f32 %v417_v50, 0.0  ;;  %v495_v55 = vmax.f32 %v437_v51, 0.0 }
  0xc5   : > { %v534_v56 = vpack.c.bf16 %v502_v52, %v502_v52  ;;  %v542_v57 = vpack.c.bf16 %v510_v53, %v510_v53 }
  0xc6   : > { %v519_v58 = vpack.c.bf16 %v487_v54, %v487_v54  ;;  %v527_v59 = vpack.c.bf16 %v495_v55, %v495_v55 }
  0xc7   : > { %567 = vst.msk [vmem:[%s937_s28 + $0x54] sm:$0xf] %vm545_vm1, %v534_v56 }
  0xc8   : > { %575 = vst.msk [vmem:[%s937_s28 + $0x74] sm:$0xf] %vm545_vm1, %v542_v57  ;;  %v456_v60 = vpop.f32.mrf.mxu2  ;;  %v476_v61 = vpop.f32.mrf.mxu3 }
  0xc9   : > { %552 = vst.msk [vmem:[%s937_s28 + $0x18] sm:$0xf] %vm545_vm1, %v519_v58  ;;  %v457_v62 = vadd.f32 %v928_v18, %v456_v60  ;;  %v477_v63 = vadd.f32 %v928_v18, %v476_v61  ;;  %v418_v0 = vpop.f32.mrf.mxu0  ;;  %v438_v1 = vpop.f32.mrf.mxu1 }
  0xca   : > { %560 = vst.msk [vmem:[%s937_s28 + $0x38] sm:$0xf] %vm545_vm1, %v527_v59  ;;  %v419_v2 = vadd.f32 %v928_v18, %v418_v0  ;;  %v439_v3 = vadd.f32 %v928_v18, %v438_v1 }
  0xcb   : > { %v503_v4 = vmax.f32 %v457_v62, 0.0  ;;  %v511_v5 = vmax.f32 %v477_v63, 0.0 }
  0xcc   : > { %v488_v6 = vmax.f32 %v419_v2, 0.0  ;;  %v496_v7 = vmax.f32 %v439_v3, 0.0 }
  0xcd   : > { %v535_v8 = vpack.c.bf16 %v503_v4, %v503_v4  ;;  %v543_v9 = vpack.c.bf16 %v511_v5, %v511_v5 }
  0xce   : > { %v520_v10 = vpack.c.bf16 %v488_v6, %v488_v6  ;;  %v528_v11 = vpack.c.bf16 %v496_v7, %v496_v7 }
  0xcf   : > { %568 = vst.msk [vmem:[%s937_s28 + $0x58] sm:$0xf] %vm545_vm1, %v535_v8 }
  0xd0   : > { %576 = vst.msk [vmem:[%s937_s28 + $0x78] sm:$0xf] %vm545_vm1, %v543_v9  ;;  %v458_v12 = vpop.f32.mrf.mxu2  ;;  %v478_v13 = vpop.f32.mrf.mxu3 }
  0xd1   : > { %553 = vst.msk [vmem:[%s937_s28 + $0x1c] sm:$0xf] %vm545_vm1, %v520_v10  ;;  %v459_v14 = vadd.f32 %v928_v18, %v458_v12  ;;  %v479_v15 = vadd.f32 %v928_v18, %v478_v13 }
  0xd2   : > { %561 = vst.msk [vmem:[%s937_s28 + $0x3c] sm:$0xf] %vm545_vm1, %v528_v11 }
  0xd3   : > { %v504_v16 = vmax.f32 %v459_v14, 0.0  ;;  %v512_v17 = vmax.f32 %v479_v15, 0.0 }
  0xd5   : > { %v536_v19 = vpack.c.bf16 %v504_v16, %v504_v16  ;;  %v544_v20 = vpack.c.bf16 %v512_v17, %v512_v17 }
  0xd7   : > { %569 = vst.msk [vmem:[%s937_s28 + $0x5c] sm:$0xf] %vm545_vm1, %v536_v19 }
  0xd8   : > { %577 = vst.msk [vmem:[%s937_s28 + $0x7c] sm:$0xf] %vm545_vm1, %v544_v20 }
  0xd9 PF: > { %s13_s14 = sadd.s32 1, %s837_s14   ;;  %s1046_s12 = smov %s833_s13 }
  0xda   : > { %p10_p5 = scmp.ge.s32.totalorder %s13_s14, 4   ;;  %s1047_s13 = smov %s1049_s15 }
  0xdc   :  { %12 = sbr.rel (!%p10_p5) target bundleno = 2 (0x2), region = 62 }

</bundles_post_ra>
